<compile_context>
chip_gen: v7x
topology: tpu7x:2x2x1
jax: 0.10.0
libtpu: 0.0.40
codegen_flags: <defaults>
</compile_context>

<pallas_src>
import functools

import numpy as np
import jax
import jax.numpy as jnp
from jax.experimental import pallas as pl
from jax.experimental.pallas import tpu as pltpu

N_COMPONENTS = 8   # config.n_components (small synthetic value)
BATCH = 2
EPS = 1e-5
LANE = 128

# (C_in, C_out, K, stride, padding) for deconv1..deconv5 — matches the module.
LAYER_CFG = [
    (N_COMPONENTS, 32, 4, 1, 0),
    (32, 16, 7, 7, 0),
    (16, 8, 3, 3, 0),
    (8, 4, 5, 5, 2),
    (4, 1, 7, 3, 1),
]


def _pad128(n):
    return ((n + LANE - 1) // LANE) * LANE


def _pad8(n):
    return ((n + 7) // 8) * 8


# ----------------------------------------------------------------------------
# Static geometry + slab offsets
# ----------------------------------------------------------------------------
def build_layers(batch):
    layers = []
    l_in, prev_width, prev_p = 1, None, 0
    s_col = m_row = aux_row = 0
    for (c_in, c_out, k, s, p) in LAYER_CFG:
        l_full = (l_in - 1) * s + k       # ConvTranspose1d length before crop
        l_out = l_full - 2 * p            # after the `padding` crop
        width = _pad128(l_full)
        blk = _pad8(batch * c_out)        # tap-block row count (sublane aligned)
        d = dict(c_in=c_in, c_out=c_out, k=k, s=s, p=p,
                 l_in=l_in, l_full=l_full, l_out=l_out, width=width,
                 bc_in=batch * c_in, bc_out=batch * c_out, blk=blk,
                 prev_width=prev_width, prev_p=prev_p,
                 s_col=(None if prev_width is None else s_col),
                 m_row=m_row, aux_row=aux_row)
        layers.append(d)
        if prev_width is not None:
            s_col += width
        m_row += k * blk
        aux_row += blk
        l_in, prev_width, prev_p = l_out, width, p
    return layers, s_col, m_row, aux_row


# ----------------------------------------------------------------------------
# Parameter setup (plain JAX / numpy glue)
# ----------------------------------------------------------------------------
def init_params(key):
    """Deterministic parameter init (shapes from the module's __init__)."""
    params = []
    for (c_in, c_out, k, _s, _p) in LAYER_CFG:
        key, kw, kb, kg, kbe = jax.random.split(key, 5)
        bound = 1.0 / np.sqrt(c_in * k)
        w = jax.random.uniform(kw, (c_in, c_out, k), jnp.float32, -bound, bound)
        # Snap weights to bf16-representable values: the kernel stores them in
        # bf16, so the f64 reference then differs only by activation rounding.
        w = w.astype(jnp.bfloat16).astype(jnp.float32)
        b = jax.random.uniform(kb, (c_out,), jnp.float32, -bound, bound)
        gamma = jax.random.uniform(kg, (c_out,), jnp.float32, 0.5, 1.5)
        beta = jax.random.uniform(kbe, (c_out,), jnp.float32, -0.5, 0.5)
        params.append((w, b, gamma, beta))
    return params


def prepare_operands(params, layers, batch, s_cols, m_rows, aux_rows):
    """Build the 3 constant slabs (one DMA each)."""
    # --- scatter slab (bf16, exact 0/1): lane-packed, one column block per
    #     layer >= 2.  Row r = previous layer's spatial column, col = target. ---
    s_rows = max(d['prev_width'] for d in layers if d['prev_width'] is not None)
    s_slab = np.zeros((s_rows, s_cols), np.float32)
    for d in layers:
        if d['s_col'] is None:
            continue
        for i in range(d['l_in']):
            s_slab[d['prev_p'] + i, d['s_col'] + i * d['s']] = 1.0

    # --- channel-mix slab (bf16): per layer, K tap-blocks of `blk` rows,
    #     each block = kron(I_B, W_k^T), lanes [0, B*C_in). ---
    m_slab = np.zeros((m_rows, LANE), np.float32)
    for d, (w, _b, _g, _be) in zip(layers, params):
        w = np.asarray(w, np.float32)
        for kk in range(d['k']):
            r0 = d['m_row'] + kk * d['blk']
            for bb in range(batch):
                m_slab[r0 + bb * d['c_out']:r0 + (bb + 1) * d['c_out'],
                       bb * d['c_in']:(bb + 1) * d['c_in']] = w[:, :, kk].T

    # --- aux slab (f32): per layer `blk` rows: lanes [0:blk] = BN aggregation
    #     G (1/(B*L) baked in), lane 64 = gamma (tiled over batch), 65 = beta. ---
    aux = np.zeros((aux_rows, LANE), np.float32)
    for d, (_w, _b, g, be) in zip(layers, params):
        r0, bc = d['aux_row'], d['bc_out']
        G = np.kron(np.ones((batch, batch), np.float32),
                    np.eye(d['c_out'], dtype=np.float32)) / float(batch * d['l_out'])
        aux[r0:r0 + bc, 0:bc] = G
        aux[r0:r0 + bc, 64] = np.tile(np.asarray(g, np.float32), batch)
        aux[r0:r0 + bc, 65] = np.tile(np.asarray(be, np.float32), batch)

    return (jnp.asarray(s_slab, jnp.bfloat16),
            jnp.asarray(m_slab, jnp.bfloat16),
            jnp.asarray(aux, jnp.float32))


# ----------------------------------------------------------------------------
# Tiny probe: pin down pltpu.roll's shift direction (defensive, runs once)
# ----------------------------------------------------------------------------
def _roll_moves_right():
    def probe(x_ref, o_ref):
        o_ref[...] = pltpu.roll(x_ref[...], 1, axis=1)

    x = jnp.zeros((8, LANE), jnp.float32).at[0, 0].set(1.0)
    out = pl.pallas_call(
        probe,
        out_shape=jax.ShapeDtypeStruct((8, LANE), jnp.float32),
        in_specs=[pl.BlockSpec(memory_space=pltpu.MemorySpace.VMEM)],
        out_specs=pl.BlockSpec(memory_space=pltpu.MemorySpace.VMEM),
    )(x)
    out = np.asarray(jax.block_until_ready(out))
    if out[0, LANE - 1] == 1.0:
        return False           # positive shift moves data towards lower lanes
    return True                # jnp.roll convention (towards higher lanes)


# ----------------------------------------------------------------------------
# Pallas kernel: full forward pass (5x compact deconv + fused BN [+ ReLU])
# ----------------------------------------------------------------------------
def promptgen_kernel(x_ref, s_ref, m_ref, aux_ref, out_ref, *, layers, roll_right):
    nl = len(layers)
    a_bf = x_ref[...]                        # (B*C0, 128) bf16, data in column 0
    for l, d in enumerate(layers):
        W, K, blk = d['width'], d['k'], d['blk']

        # ---- ConvTranspose1d (bias dropped: exactly cancelled by the
        #      following training-mode BatchNorm mean subtraction) ----
        if d['s_col'] is None:               # layer 1: L_in == 1, stride == 1
            a_s = a_bf
        else:
            # 0/1 stride-scatter (also crops the previous layer's padding).
            # bf16 x bf16 matmul, exact because S is 0/1 and a_bf is bf16.
            s = s_ref[0:d['prev_width'], d['s_col']:d['s_col'] + W]
            a_s = jnp.dot(a_bf, s,
                          preferred_element_type=jnp.float32).astype(jnp.bfloat16)

        # All K tap channel-mixes fused into a single bf16 matmul (f32 acc).
        m = m_ref[d['m_row']:d['m_row'] + K * blk, 0:d['bc_in']]
        z = jnp.dot(m, a_s, preferred_element_type=jnp.float32)   # (K*blk, W)

        # Tap k lands shifted right by k lanes: XLU roll + one iota mask.
        col = jax.lax.broadcasted_iota(jnp.int32, (blk, W), 1)
        y = z[0:blk]
        for k in range(1, K):
            sh = k if roll_right else W - k
            zk = pltpu.roll(z[k * blk:(k + 1) * blk], sh, axis=1)
            y = y + jnp.where(col >= k, zk, 0.0)

        # ---- BatchNorm1d (training-mode batch stats, biased variance) ----
        if d['p'] > 0:
            # Exclude the columns the `padding` crop removes from the stats.
            ym = jnp.where((col >= d['p']) & (col < d['p'] + d['l_out']), y, 0.0)
        else:
            # p == 0: lane-padding columns of y are already exactly zero.
            ym = y
        s1 = jnp.sum(ym, axis=1, keepdims=True)                    # (blk, 1)
        s2 = jnp.sum(ym * ym, axis=1, keepdims=True)
        g = aux_ref[d['aux_row']:d['aux_row'] + blk, 0:blk]        # 1/(B*L) baked in
        mean = jnp.dot(g, s1, preferred_element_type=jnp.float32)
        msq = jnp.dot(g, s2, preferred_element_type=jnp.float32)
        var = msq - mean * mean
        gamma = aux_ref[d['aux_row']:d['aux_row'] + blk, 64:65]
        beta = aux_ref[d['aux_row']:d['aux_row'] + blk, 65:66]
        scale = gamma * jax.lax.rsqrt(var + EPS)
        shift = beta - mean * scale
        y = y * scale + shift

        if l < nl - 1:
            y = jnp.maximum(y, 0.0)          # ReLU after bn1..bn4, none after bn5
            a_bf = y.astype(jnp.bfloat16)    # bf16 input for the next matmuls
        else:
            out_ref[...] = y                 # lane-dense (8, 1280) f32 store


def promptgen_forward(x, params):
    batch = x.shape[0]
    layers, s_cols, m_rows, aux_rows = build_layers(batch)
    s_slab, m_slab, aux_slab = prepare_operands(params, layers, batch,
                                                s_cols, m_rows, aux_rows)
    roll_right = _roll_moves_right()

    d0, dl = layers[0], layers[-1]
    # Layer-1 "scatter" is trivial (L_in == 1): lay x out as (B*C0, W1) with the
    # single spatial column at position 0 (wrapper-side layout plumbing).
    x_col = x.reshape(batch * d0['c_in'], 1)
    x_pad = jnp.pad(x_col, ((0, 0), (0, d0['width'] - 1))).astype(jnp.bfloat16)

    kernel = functools.partial(promptgen_kernel, layers=layers,
                               roll_right=roll_right)
    out_flat = pl.pallas_call(
        kernel,
        out_shape=jax.ShapeDtypeStruct((dl['blk'], dl['width']), jnp.float32),
        in_specs=[pl.BlockSpec(memory_space=pltpu.MemorySpace.VMEM)] * 4,
        out_specs=pl.BlockSpec(memory_space=pltpu.MemorySpace.VMEM),
        compiler_params=pltpu.CompilerParams(vmem_limit_bytes=16 * 1024 * 1024),
    )(x_pad, s_slab, m_slab, aux_slab)

    # Real data lives in rows [0, B*C_out5) and columns [p5, p5 + L_out5);
    # PyTorch layout is (B, 1, L).
    p5, l5, c5 = dl['p'], dl['l_out'], dl['c_out']
    return out_flat[:batch * c5, p5:p5 + l5].reshape(batch, c5, l5)


# ----------------------------------------------------------------------------
# Pure-numpy reference (direct scatter-add transposed convolution, with bias)
# ----------------------------------------------------------------------------
def ref_forward_np(x, params):
    a = np.asarray(x, np.float64)[:, :, None]  # (B, C0, 1)  == x.unsqueeze(-1)
    num_layers = len(LAYER_CFG)
    for idx, ((w, b, gamma, beta), (_c_in, c_out, k, s, p)) in enumerate(
            zip(params, LAYER_CFG)):
        w = np.asarray(w, np.float64)
        b = np.asarray(b, np.float64)
        g = np.asarray(gamma, np.float64)
        be = np.asarray(beta, np.float64)
        bsz, _, l_in = a.shape
        l_full = (l_in - 1) * s + k
        out = np.zeros((bsz, c_out, l_full), np.float64)
        for i in range(l_in):
            out[:, :, i * s:i * s + k] += np.einsum('bc,cok->bok', a[:, :, i], w)
        if p > 0:
            out = out[:, :, p:l_full - p]
        out = out + b[None, :, None]
        mean = out.mean(axis=(0, 2), keepdims=True)
        var = out.var(axis=(0, 2), keepdims=True)  # biased, like training-mode BN
        out = (out - mean) / np.sqrt(var + EPS) * g[None, :, None] + be[None, :, None]
        if idx < num_layers - 1:
            out = np.maximum(out, 0.0)
        a = out
    return a  # (B, 1, 1250)


if __name__ == "__main__":
    key = jax.random.PRNGKey(0)
    key, kx, kp = jax.random.split(key, 3)
    x = jax.random.normal(kx, (BATCH, N_COMPONENTS), jnp.float32)
    x = x.astype(jnp.bfloat16).astype(jnp.float32)   # bf16-representable inputs

    params = init_params(kp)

    out = promptgen_forward(x, params)
    out = jax.block_until_ready(out)

    assert out.shape == (BATCH, 1, 1250), out.shape
    ref = ref_forward_np(np.asarray(x), params)
    # bf16 matmul activations (weights are bf16-exact): allow a few percent.
    np.testing.assert_allclose(np.asarray(out, np.float64), ref, rtol=5e-2, atol=5e-2)

    print("KERNEL_OK")
</pallas_src>

<mosaic_0001>
module attributes {stable_mosaic.version = 11 : i64} {
  func.func @probe(%arg0: memref<8x128xf32, #tpu.memory_space<vmem>>, %arg1: memref<8x128xf32, #tpu.memory_space<vmem>>) attributes {dimension_semantics = [], scalar_prefetch = 0 : i64, scratch_operands = 0 : i64, tpu.core_type = #tpu.core_type<tc>} {
    %c0 = arith.constant 0 : index
    %c0_0 = arith.constant 0 : index
    %0 = vector.load %arg0[%c0, %c0_0] : memref<8x128xf32, #tpu.memory_space<vmem>>, vector<8x128xf32>
    %c1_i32 = arith.constant 1 : i32
    %1 = tpu.dynamic_rotate %0 by %c1_i32 dim 1 : vector<8x128xf32>, i32 -> vector<8x128xf32>
    %c0_1 = arith.constant 0 : index
    %c0_2 = arith.constant 0 : index
    %2 = vector.load %arg1[%c0_1, %c0_2] : memref<8x128xf32, #tpu.memory_space<vmem>>, vector<8x128xf32>
    tpu.vector_store %arg1[%c0_1, %c0_2], %1 {strides = array<i32>} : memref<8x128xf32, #tpu.memory_space<vmem>>, vector<8x128xf32>,
    return
  }
}

</mosaic_0001>

<bundles_post_ra>
// kernel: tpu_custom_call.1
= control target key start
LH: loop header
LB: loop body
LE: loop exit
PB: predicated region body
PF: predicated region fallthrough
CT: control target
= control target key end

     0   :  { %6 = vsyncpa [#allocation3], 0  ;;  %s128_s0 = inlined_call_operand.hbm [shape: f32[8,128], index: 0, kind: input, shape index: {}]   ;;  %s129_s1 = inlined_call_operand.hbm [shape: f32[8,128], index: 1, kind: output, shape index: {}]  }
   0x1   :  { %7 = vsyncpa [#allocation4], 0  ;;  %s91_s6 = smov [#allocation2]   ;;  %s43_s10 = scalar_lea.hbm %s128_s0, 128 }
   0x2   :  { %s14_s7 = sshll.u32 %s91_s6, 4  ;;  %p44_p0 = scmp.ne.s32.totalorder %s128_s0, %s43_s10  ;;  %s15_s7 = int_to_ptr.vmem [resolvable:$true] %s14_s7 }
   0x3   :  { %p47_p1 = scmp.lt.u32.totalorder %s43_s10, %s128_s0 }
   0x5   :  { %p49_p2 = pnand %p47_p1, %p44_p0 }
   0x7   :  { %52 = shalt.err (!%p49_p2)
}
   0x8   :  { %s53_s15 = scalar_lea.vmem %s15_s7, 128  ;;  %p58_p4 = scmp.lt.s32.totalorder %s15_s7, %s15_s7 }
   0x9   :  { %p54_p3 = scmp.ne.s32.totalorder %s15_s7, %s53_s15  ;;  %p59_p5 = scmp.lt.s32.totalorder %s53_s15, %s53_s15 }
   0xb   :  { %p60_p6 = por %p59_p5, %p58_p4 }
   0xd   :  { %p61_p7 = pnand %p60_p6, %p54_p3 }
   0xf   :  { %64 = shalt.err (!%p61_p7)
}
  0x10   :  { %17 = dma.hbm_to_vmem [thread:$0]  %s128_s0, 128, %s15_s7, [#allocation3]  }
  0x11   :  { %87 = dma.done.wait [#allocation3], 128  }
  0x12   :  { %88 = vsyncadd [#allocation3], 4294967168  ;;  %v21_v0 = vld [vmem:[#allocation2] sm:$0xff]  ;;  %s92_s18 = smov 1   ;;  %s93_s19 = smov [#allocation5]  }
  0x13   :  { %22 = vrot.lane.b32.xlu0 %v21_v0, %s92_s18  ;;  %s31_s20 = sshll.u32 %s93_s19, 4  ;;  %s32_s20 = int_to_ptr.vmem [resolvable:$true] %s31_s20 }
  0x14   :  { %s65_s21 = scalar_lea.vmem %s32_s20, 128  ;;  %p70_p9 = scmp.lt.s32.totalorder %s32_s20, %s32_s20 }
  0x15   :  { %p66_p8 = scmp.ne.s32.totalorder %s32_s20, %s65_s21  ;;  %p71_p10 = scmp.lt.s32.totalorder %s65_s21, %s65_s21 }
  0x17   :  { %p72_p11 = por %p71_p10, %p70_p9 }
  0x19   :  { %p73_p12 = pnand %p72_p11, %p66_p8 }
  0x85   :  { %v23_v1 = vpop.permute.xlu0 %22 }
  0x86   :  { %24 = vst [vmem:[#allocation5] sm:$0xff] %v23_v1 }
  0x87   :  { %76 = shalt.err (!%p73_p12)
}
  0x88   :  { %s77_s0 = scalar_lea.hbm %s129_s1, 128 }
  0x89   :  { %p78_p13 = scmp.ne.s32.totalorder %s129_s1, %s77_s0  ;;  %p81_p0 = scmp.lt.u32.totalorder %s77_s0, %s129_s1 }
  0x8b   :  { %p83_p1 = pnand %p81_p0, %p78_p13 }
  0x8d   :  { %86 = shalt.err (!%p83_p1)
}
  0x8e   :  { %34 = dma.vmem_to_hbm [thread:$0]  %s32_s20, 128, %s129_s1, [#allocation4]  }
  0x8f   :  { %89 = dma.done.wait [#allocation4], 128  }
  0x90   :  { %90 = vsyncadd [#allocation4], 4294967168 }
  0x91   :  { %38 = vsyncpa [#allocation3], 1 }
  0x92   :  { %39 = vsyncpa [#allocation4], 1 }

</bundles_post_ra>
